<compile_context>
chip_gen: v7x
topology: tpu7x:2x2x1
jax: 0.10.0
libtpu: 0.0.40
codegen_flags: <defaults>
</compile_context>

<pallas_src>
import jax
import jax.numpy as jnp
from jax import lax
from jax.experimental import pallas as pl
from jax.experimental.pallas import tpu as pltpu

# TODO(synk): the original module takes an arbitrary `func`; only this concrete
# elementwise augmentation func(x) = 1.5*x + 0.1 is fused into the kernel.
_FUNC_SCALE = 1.5
_FUNC_SHIFT = 0.1

_LANE = 128
_TARGET_TILE_BYTES = 8 * 1024 * 1024   # ~8 MiB/tile: 4 buffers = 32 MiB VMEM, fits v7x
_SMALL_INPUT_BYTES = 2 * 1024 * 1024   # below this, plain XLA fusion beats a kernel launch


def _func_kernel(x_ref, o_ref):
    # func(x) = 1.5*x + 0.1 — pure VPU elementwise; the kernel is HBM-bound.
    o_ref[...] = (x_ref[...] * _FUNC_SCALE + _FUNC_SHIFT).astype(o_ref.dtype)


def _sublane(itemsize):
    # Minimum packed second-minor multiple: (8,128) f32, (16,128) bf16, (32,128) i8/fp8.
    return {4: 8, 2: 16, 1: 32}.get(itemsize, 8)


def _choose_exact_tiling(total, itemsize):
    """Pick (cols, rows, tile_r) with zero padding; returns None if ragged."""
    sub = _sublane(itemsize)
    for cols in (4096, 2048, 1024, 512, 256, 128):
        if total % cols != 0:
            continue
        rows = total // cols
        cap = max(sub, (_TARGET_TILE_BYTES // (cols * itemsize)) // sub * sub)
        if rows <= cap:
            return cols, rows, rows            # single full-extent tile (always legal)
        if rows % sub != 0:
            continue
        # Largest divisor of rows that is a multiple of `sub` and <= cap.
        r_units, cap_units = rows // sub, cap // sub
        for d in range(cap_units, 0, -1):
            if r_units % d == 0:
                return cols, rows, d * sub
    return None


def _apply_func_pallas(x):
    """func(x) = 1.5*x + 0.1 via a lane-dense, double-buffered streaming kernel."""
    orig_shape = x.shape
    total = x.size
    itemsize = x.dtype.itemsize

    exact = _choose_exact_tiling(total, itemsize)
    if exact is not None:
        cols, rows, tile_r = exact
        slab = x.reshape(rows, cols)
        sliced = False
    else:
        # Ragged fallback: pad to a tile multiple, slice the tail off afterwards.
        sub = _sublane(itemsize)
        cols = 1024 if total >= 1024 else _LANE
        r = pl.cdiv(total, cols)
        cap = max(sub, (_TARGET_TILE_BYTES // (cols * itemsize)) // sub * sub)
        tile_r = min(cap, pl.cdiv(r, sub) * sub)
        rows = pl.cdiv(r, tile_r) * tile_r
        flat = jnp.pad(x.reshape(-1), (0, rows * cols - total))
        slab = flat.reshape(rows, cols)
        sliced = True

    tile_bytes = tile_r * cols * itemsize
    out = pl.pallas_call(
        _func_kernel,
        out_shape=jax.ShapeDtypeStruct((rows, cols), x.dtype),
        grid=(rows // tile_r,),
        in_specs=[pl.BlockSpec((tile_r, cols), lambda i: (i, 0))],
        out_specs=pl.BlockSpec((tile_r, cols), lambda i: (i, 0)),
        # Only alias on the padded path: there the slab is guaranteed a fresh
        # throwaway buffer even under jit, so aliasing halves peak HBM footprint
        # without ever forcing XLA to insert a defensive copy.
        input_output_aliases=({0: 0} if sliced else {}),
        cost_estimate=pl.CostEstimate(
            flops=2 * rows * cols,
            transcendentals=0,
            bytes_accessed=2 * rows * cols * itemsize),
        compiler_params=pltpu.CompilerParams(
            # TODO(synk): on v7x, CORE_PARALLEL (or pl.core_map over a TC mesh)
            # would shard this 1-D grid across both TensorCores; "parallel" is
            # kept here for portability across v5e/v6e/v7x.
            dimension_semantics=("parallel",),
            # 1 in + 1 out, each double-buffered = 4x tile bytes, plus headroom.
            vmem_limit_bytes=int(4 * tile_bytes + (8 << 20)),
        ),
    )(slab)

    if sliced:
        return out.reshape(-1)[:total].reshape(orig_shape)
    return out.reshape(orig_shape)


def _apply_func(x):
    # Tiny tensors: XLA fuses the elementwise op for free; skip the kernel launch.
    if x.size * x.dtype.itemsize < _SMALL_INPUT_BYTES:
        return x * _FUNC_SCALE + _FUNC_SHIFT
    return _apply_func_pallas(x)


def random_apply(x, p, key):
    """RandomApply forward: return x unchanged if u > p, else func(x).

    The decision is drawn once in the wrapper (jax.random); torch's RNG stream
    is not reproduced, only the Bernoulli(p) semantics.  When the draw is
    concrete (eager mode) the identity branch returns x itself — zero HBM work.
    """
    u = jax.random.uniform(key, (), dtype=jnp.float32)
    apply = u <= jnp.float32(p)
    try:
        take = bool(apply)
    except jax.errors.ConcretizationTypeError:
        # Under tracing (jit/vmap) fall back to lax.cond.
        return lax.cond(apply, _apply_func, lambda y: y, x)
    return _apply_func(x) if take else x


if __name__ == "__main__":
    key = jax.random.PRNGKey(0)
    kx, kl, ku = jax.random.split(key, 3)

    # Small NCHW input consistent with an image-augmentation pipeline.
    x = jax.random.normal(kx, (2, 4, 16, 16), dtype=jnp.float32)
    p = 0.5
    fx = x * _FUNC_SCALE + _FUNC_SHIFT

    # 1) Exercise the fused Pallas func kernel directly (runs the kernel once).
    y_func = jax.block_until_ready(_apply_func_pallas(x))
    assert y_func.shape == x.shape
    assert jnp.allclose(y_func, fx, atol=1e-6), "func kernel mismatch (small)"

    # 2) Exercise the large, multi-tile streaming path (no padding, 2 grid steps).
    xl = jax.random.normal(kl, (16, 3, 256, 256), dtype=jnp.float32)
    yl = jax.block_until_ready(_apply_func_pallas(xl))
    assert jnp.allclose(yl, xl * _FUNC_SCALE + _FUNC_SHIFT, atol=1e-6), \
        "func kernel mismatch (tiled)"

    # 3) Full RandomApply forward: output must equal x or func(x).
    y = jax.block_until_ready(random_apply(x, p, ku))
    is_identity = bool(jnp.allclose(y, x, atol=1e-6))
    is_func = bool(jnp.allclose(y, fx, atol=1e-6))
    assert is_identity or is_func, "output is neither x nor func(x)"

    print("KERNEL_OK")
</pallas_src>

<mosaic_0001>
module attributes {stable_mosaic.version = 11 : i64} {
  func.func @_func_kernel(%arg0: i32, %arg1: memref<1x2048xf32, #tpu.memory_space<vmem>>, %arg2: memref<1x2048xf32, #tpu.memory_space<vmem>>) attributes {dimension_semantics = [#tpu.dimension_semantics<parallel>], iteration_bounds = array<i64: 1>, scalar_prefetch = 0 : i64, scratch_operands = 0 : i64, tpu.core_type = #tpu.core_type<tc>, window_params = [{transform_indices = @transform_0, window_bounds = array<i64: 1, 2048>}, {transform_indices = @transform_1, window_bounds = array<i64: 1, 2048>}]} {
    %c0 = arith.constant 0 : index
    %c0_0 = arith.constant 0 : index
    %0 = vector.load %arg1[%c0, %c0_0] : memref<1x2048xf32, #tpu.memory_space<vmem>>, vector<1x2048xf32>
    %cst = arith.constant 1.500000e+00 : f32
    %1 = vector.broadcast %cst : f32 to vector<1x2048xf32>
    %2 = arith.mulf %0, %1 : vector<1x2048xf32>
    %cst_1 = arith.constant 1.000000e-01 : f32
    %3 = vector.broadcast %cst_1 : f32 to vector<1x2048xf32>
    %4 = arith.addf %2, %3 : vector<1x2048xf32>
    %c0_2 = arith.constant 0 : index
    %c0_3 = arith.constant 0 : index
    %5 = vector.load %arg2[%c0_2, %c0_3] : memref<1x2048xf32, #tpu.memory_space<vmem>>, vector<1x2048xf32>
    tpu.vector_store %arg2[%c0_2, %c0_3], %4 {strides = array<i32>} : memref<1x2048xf32, #tpu.memory_space<vmem>>, vector<1x2048xf32>,
    return
  }
  func.func @transform_0(%arg0: i32) -> (i32, i32) {
    %c0_i32 = arith.constant 0 : i32
    %c0_i32_0 = arith.constant 0 : i32
    return %arg0, %c0_i32 : i32, i32
  }
  func.func @transform_1(%arg0: i32) -> (i32, i32) {
    %c0_i32 = arith.constant 0 : i32
    %c0_i32_0 = arith.constant 0 : i32
    return %arg0, %c0_i32 : i32, i32
  }
}

</mosaic_0001>

<bundles_post_ra>
// kernel: tpu_custom_call.1
= control target key start
LH: loop header
LB: loop body
LE: loop exit
PB: predicated region body
PF: predicated region fallthrough
CT: control target
= control target key end

     0   :  { %6 = vsyncpa [#allocation3], 0  ;;  %s130_s0 = inlined_call_operand.hbm [shape: f32[1,2048], index: 0, kind: input, shape index: {}]   ;;  %s131_s1 = inlined_call_operand.hbm [shape: f32[1,2048], index: 1, kind: output, shape index: {}]  }
   0x1   :  { %7 = vsyncpa [#allocation4], 0  ;;  %s94_s6 = smov [#allocation2]   ;;  %s46_s10 = scalar_lea.hbm %s130_s0, 256 }
   0x2   :  { %s14_s7 = sshll.u32 %s94_s6, 4  ;;  %p47_p0 = scmp.ne.s32.totalorder %s130_s0, %s46_s10  ;;  %s15_s7 = int_to_ptr.vmem [resolvable:$true] %s14_s7 }
   0x3   :  { %p50_p1 = scmp.lt.u32.totalorder %s46_s10, %s130_s0 }
   0x5   :  { %p52_p2 = pnand %p50_p1, %p47_p0 }
   0x7   :  { %55 = shalt.err (!%p52_p2)
}
   0x8   :  { %s56_s15 = scalar_lea.vmem %s15_s7, 256  ;;  %p61_p4 = scmp.lt.s32.totalorder %s15_s7, %s15_s7 }
   0x9   :  { %p57_p3 = scmp.ne.s32.totalorder %s15_s7, %s56_s15  ;;  %p62_p5 = scmp.lt.s32.totalorder %s56_s15, %s56_s15 }
   0xb   :  { %p63_p6 = por %p62_p5, %p61_p4 }
   0xd   :  { %p64_p7 = pnand %p63_p6, %p57_p3 }
   0xf   :  { %67 = shalt.err (!%p64_p7)
}
  0x10   :  { %17 = dma.hbm_to_vmem [thread:$0]  %s130_s0, 256, %s15_s7, [#allocation3]  }
  0x11   :  { %90 = dma.done.wait [#allocation3], 256  }
  0x12   :  { %91 = vsyncadd [#allocation3], 4294967040  ;;  %v21_v0 = vld [vmem:[#allocation2] sm:$0xff]  ;;  %v22_v1 = vld [vmem:[#allocation2 + $0x8] sm:$0xff]  ;;  %s95_s18 = smov [#allocation5]  }
  0x13   :  { %s35_s19 = sshll.u32 %s95_s18, 4  ;;  %v23_v2 = vmul.f32 1.5, %v21_v0  ;;  %v24_v3 = vmul.f32 1.5, %v22_v1  ;;  %s36_s19 = int_to_ptr.vmem [resolvable:$true] %s35_s19 }
  0x14   :  { %s68_s20 = scalar_lea.vmem %s36_s19, 256  ;;  %p73_p9 = scmp.lt.s32.totalorder %s36_s19, %s36_s19 }
  0x15   :  { %v25_v4 = vadd.f32 0.1, %v23_v2  ;;  %v26_v5 = vadd.f32 0.1, %v24_v3  ;;  %p69_p8 = scmp.ne.s32.totalorder %s36_s19, %s68_s20  ;;  %p74_p10 = scmp.lt.s32.totalorder %s68_s20, %s68_s20 }
  0x17   :  { %27 = vst [vmem:[#allocation5] sm:$0xff] %v25_v4  ;;  %28 = vst [vmem:[#allocation5 + $0x8] sm:$0xff] %v26_v5  ;;  %p75_p11 = por %p74_p10, %p73_p9 }
  0x19   :  { %p76_p12 = pnand %p75_p11, %p69_p8 }
  0x1b   :  { %79 = shalt.err (!%p76_p12)
}
  0x1c   :  { %s80_s22 = scalar_lea.hbm %s131_s1, 256 }
  0x1d   :  { %p81_p13 = scmp.ne.s32.totalorder %s131_s1, %s80_s22  ;;  %p84_p0 = scmp.lt.u32.totalorder %s80_s22, %s131_s1 }
  0x1f   :  { %p86_p1 = pnand %p84_p0, %p81_p13 }
  0x21   :  { %89 = shalt.err (!%p86_p1)
}
  0x22   :  { %38 = dma.vmem_to_hbm [thread:$0]  %s36_s19, 256, %s131_s1, [#allocation4]  }
  0x23   :  { %92 = dma.done.wait [#allocation4], 256  }
  0x24   :  { %93 = vsyncadd [#allocation4], 4294967040 }
  0x25   :  { %42 = vsyncpa [#allocation3], 1 }
  0x26   :  { %43 = vsyncpa [#allocation4], 1 }

</bundles_post_ra>
